<compile_context>
chip_gen: v5e
topology: v5e:2x2
jax: 0.10.0
libtpu: 0.0.40
codegen_flags: <defaults>
</compile_context>

<pallas_src>
import functools

import jax
import jax.numpy as jnp
from jax.experimental import pallas as pl
from jax.experimental.pallas import tpu as pltpu


def _label_smoothing_kernel(x_ref, t_ref, out_ref, *,
                            confidence, smoothing, n_rows, row_tile, n_classes):
    i = pl.program_id(0)

    x = x_ref[...].astype(jnp.float32)          # (TN, C)
    t = t_ref[...]                              # (TN, 1) int32

    # Stable logsumexp along the class (lane) axis.
    m = jnp.max(x, axis=-1, keepdims=True)      # (TN, 1)   XLU reduce
    shifted = x - m                             # (TN, C)   VPU
    lse = jnp.log(jnp.sum(jnp.exp(shifted), axis=-1, keepdims=True))  # EUP + XLU

    # Fused loss:
    #   nll    = lse - shifted[target]
    #   smooth = lse - mean(shifted)
    #   loss   = confidence*nll + smoothing*smooth
    #          = lse - sum(shifted * w),   w = confidence*onehot + smoothing/C
    uniform_w = smoothing / n_classes
    col = jax.lax.broadcasted_iota(jnp.int32, x.shape, 1)
    w = jnp.where(col == t, confidence + uniform_w, uniform_w)        # (TN, C)
    loss = lse - jnp.sum(shifted * w, axis=-1, keepdims=True)         # (TN, 1)

    # Mask rows past the real N (padded / partial last tile) -> contribute 0.
    row = i * row_tile + jax.lax.broadcasted_iota(jnp.int32, loss.shape, 0)
    loss = jnp.where(row < n_rows, loss, 0.0)

    out_ref[...] = loss


def _pick_row_tile(n_rows, n_classes, vmem_budget_bytes):
    """Largest power-of-two row tile whose double-buffered f32 x-tile fits budget."""
    max_rows = max(8, vmem_budget_bytes // (2 * n_classes * 4))
    row_tile = 8
    while row_tile * 2 <= max_rows and row_tile < 1024:
        row_tile *= 2
    # Don't make the tile (much) larger than the problem itself.
    n_pad8 = ((n_rows + 7) // 8) * 8
    row_tile = min(row_tile, max(8, n_pad8))
    return ((row_tile + 7) // 8) * 8            # multiple of 8 (sublane tiling)


def label_smoothing_loss(x, target, smoothing=0.1, *, row_tile=None,
                         vmem_budget_bytes=8 << 20):
    """x: (N, C) float logits; target: (N,) int class indices. Returns scalar mean loss."""
    N, C = x.shape
    confidence = 1.0 - smoothing

    if row_tile is None:
        row_tile = _pick_row_tile(N, C, vmem_budget_bytes)
    assert row_tile % 8 == 0

    num_tiles = pl.cdiv(N, row_tile)
    n_pad = num_tiles * row_tile

    t2 = target.reshape(N, 1).astype(jnp.int32)

    kernel = functools.partial(
        _label_smoothing_kernel,
        confidence=float(confidence),
        smoothing=float(smoothing),
        n_rows=int(N),
        row_tile=int(row_tile),
        n_classes=int(C),
    )

    per_row = pl.pallas_call(
        kernel,
        out_shape=jax.ShapeDtypeStruct((n_pad, 1), jnp.float32),
        grid_spec=pltpu.PrefetchScalarGridSpec(
            num_scalar_prefetch=0,
            grid=(num_tiles,),
            in_specs=[
                pl.BlockSpec((row_tile, C), lambda i: (i, 0)),
                pl.BlockSpec((row_tile, 1), lambda i: (i, 0)),
            ],
            out_specs=pl.BlockSpec((row_tile, 1), lambda i: (i, 0)),
        ),
        compiler_params=pltpu.CompilerParams(
            dimension_semantics=("parallel",),      # independent tiles -> both v7x TCs
            vmem_limit_bytes=32 << 20,              # safe on v5e/v6e/v7x
        ),
    )(x, t2)

    # Tiny final reduction in the wrapper (padded rows are already 0).
    return jnp.sum(per_row) / jnp.float32(N)


def _reference(x, target, smoothing):
    confidence = 1.0 - smoothing
    logprobs = jax.nn.log_softmax(x.astype(jnp.float32), axis=-1)
    nll = -jnp.take_along_axis(logprobs, target[:, None], axis=-1)[:, 0]
    smooth = -jnp.mean(logprobs, axis=-1)
    return jnp.mean(confidence * nll + smoothing * smooth)


if __name__ == "__main__":
    key = jax.random.PRNGKey(0)
    smoothing = 0.1

    # Case 1: small, tile == full problem.
    k1, k2, k3, k4 = jax.random.split(key, 4)
    N1, C1 = 8, 32
    x1 = jax.random.normal(k1, (N1, C1), dtype=jnp.float32)
    t1 = jax.random.randint(k2, (N1,), 0, C1, dtype=jnp.int32)
    loss1 = jax.block_until_ready(label_smoothing_loss(x1, t1, smoothing=smoothing))
    ref1 = _reference(x1, t1, smoothing)
    assert jnp.allclose(loss1, ref1, atol=1e-5, rtol=1e-5), (loss1, ref1)

    # Case 2: ragged N (exercises cdiv grid + in-kernel row masking).
    N2, C2 = 50, 160
    x2 = jax.random.normal(k3, (N2, C2), dtype=jnp.float32)
    t2 = jax.random.randint(k4, (N2,), 0, C2, dtype=jnp.int32)
    loss2 = jax.block_until_ready(label_smoothing_loss(x2, t2, smoothing=smoothing))
    ref2 = _reference(x2, t2, smoothing)
    assert jnp.allclose(loss2, ref2, atol=1e-5, rtol=1e-5), (loss2, ref2)

    print("KERNEL_OK")
</pallas_src>

<mosaic_0001>
module attributes {stable_mosaic.version = 11 : i64} {
  func.func @_label_smoothing_kernel(%arg0: i32, %arg1: memref<8x32xf32, #tpu.memory_space<vmem>>, %arg2: memref<8x1xi32, #tpu.memory_space<vmem>>, %arg3: memref<8x1xf32, #tpu.memory_space<vmem>>) attributes {dimension_semantics = [#tpu.dimension_semantics<parallel>], iteration_bounds = array<i64: 1>, scalar_prefetch = 0 : i64, scratch_operands = 0 : i64, tpu.core_type = #tpu.core_type<tc>, window_params = [{transform_indices = @transform_0, window_bounds = array<i64: 8, 32>}, {transform_indices = @transform_1, window_bounds = array<i64: 8, 1>}, {transform_indices = @transform_2, window_bounds = array<i64: 8, 1>}]} {
    %c0 = arith.constant 0 : index
    %c0_0 = arith.constant 0 : index
    %0 = vector.load %arg1[%c0, %c0_0] : memref<8x32xf32, #tpu.memory_space<vmem>>, vector<8x32xf32>
    %c0_1 = arith.constant 0 : index
    %c0_2 = arith.constant 0 : index
    %1 = vector.load %arg2[%c0_1, %c0_2] : memref<8x1xi32, #tpu.memory_space<vmem>>, vector<8x1xi32>
    %cst = arith.constant dense<0xFF800000> : vector<8xf32>
    %2 = vector.multi_reduction <maximumf>, %0, %cst [1] : vector<8x32xf32> to vector<8xf32>
    %3 = vector.shape_cast %2 : vector<8xf32> to vector<8x1xf32>
    %4 = vector.broadcast %3 : vector<8x1xf32> to vector<8x32xf32>
    %5 = arith.subf %0, %4 : vector<8x32xf32>
    %6 = math.exp %5 : vector<8x32xf32>
    %cst_3 = arith.constant dense<0.000000e+00> : vector<8xf32>
    %7 = vector.multi_reduction <add>, %6, %cst_3 [1] : vector<8x32xf32> to vector<8xf32>
    %8 = vector.shape_cast %7 : vector<8xf32> to vector<8x1xf32>
    %9 = math.log %8 : vector<8x1xf32>
    %10 = tpu.iota {dimensions = array<i32: 1>} : vector<8x32xi32>
    %11 = vector.broadcast %1 : vector<8x1xi32> to vector<8x32xi32>
    %12 = arith.cmpi eq, %10, %11 : vector<8x32xi32>
    %cst_4 = arith.constant 0.903124988 : f32
    %cst_5 = arith.constant 3.125000e-03 : f32
    %13 = vector.broadcast %cst_4 : f32 to vector<8x32xf32>
    %14 = vector.broadcast %cst_5 : f32 to vector<8x32xf32>
    %15 = arith.select %12, %13, %14 : vector<8x32xi1>, vector<8x32xf32>
    %16 = arith.mulf %5, %15 : vector<8x32xf32>
    %cst_6 = arith.constant dense<0.000000e+00> : vector<8xf32>
    %17 = vector.multi_reduction <add>, %16, %cst_6 [1] : vector<8x32xf32> to vector<8xf32>
    %18 = vector.shape_cast %17 : vector<8xf32> to vector<8x1xf32>
    %19 = arith.subf %9, %18 : vector<8x1xf32>
    %c8_i32 = arith.constant 8 : i32
    %20 = arith.muli %arg0, %c8_i32 : i32
    %21 = tpu.iota {dimensions = array<i32: 0>} : vector<8x1xi32>
    %22 = vector.broadcast %20 : i32 to vector<8x1xi32>
    %23 = arith.addi %22, %21 : vector<8x1xi32>
    %c8_i32_7 = arith.constant 8 : i32
    %24 = vector.broadcast %c8_i32_7 : i32 to vector<8x1xi32>
    %25 = arith.cmpi slt, %23, %24 : vector<8x1xi32>
    %cst_8 = arith.constant 0.000000e+00 : f32
    %26 = vector.broadcast %cst_8 : f32 to vector<8x1xf32>
    %27 = arith.select %25, %19, %26 : vector<8x1xi1>, vector<8x1xf32>
    %c0_9 = arith.constant 0 : index
    %c0_10 = arith.constant 0 : index
    %28 = vector.load %arg3[%c0_9, %c0_10] : memref<8x1xf32, #tpu.memory_space<vmem>>, vector<8x1xf32>
    tpu.vector_store %arg3[%c0_9, %c0_10], %27 {strides = array<i32>} : memref<8x1xf32, #tpu.memory_space<vmem>>, vector<8x1xf32>,
    return
  }
  func.func @transform_0(%arg0: i32) -> (i32, i32) {
    %c0_i32 = arith.constant 0 : i32
    %c0_i32_0 = arith.constant 0 : i32
    return %arg0, %c0_i32 : i32, i32
  }
  func.func @transform_1(%arg0: i32) -> (i32, i32) {
    %c0_i32 = arith.constant 0 : i32
    %c0_i32_0 = arith.constant 0 : i32
    return %arg0, %c0_i32 : i32, i32
  }
  func.func @transform_2(%arg0: i32) -> (i32, i32) {
    %c0_i32 = arith.constant 0 : i32
    %c0_i32_0 = arith.constant 0 : i32
    return %arg0, %c0_i32 : i32, i32
  }
}

</mosaic_0001>

<bundles_post_ra>
// kernel: tpu_custom_call.1
= control target key start
LH: loop header
LB: loop body
LE: loop exit
PB: predicated region body
PF: predicated region fallthrough
CT: control target
= control target key end

     0   :  { %vm13_vm0 = vcmask 261120   ;;  %v57_v1 = vmov 0   ;;  %v25_v9 = vlaneseq  ;;  %v58_v12 = vmov 0.003125   ;;  %s86_s0 = inlined_call_operand.vmem [shape: f32[8,32], index: 0, kind: input, shape index: {}]   ;;  %s87_s1 = inlined_call_operand.vmem [shape: s32[8,1], index: 1, kind: input, shape index: {}]   ;;  %s88_s2 = inlined_call_operand.vmem [shape: f32[8,1], index: 2, kind: output, shape index: {}]  }
   0x1   :  { %v11_v0 = vld [vmem:[%s86_s0] sm:$0xff]  ;;  %52 = vset.pattern.permute.xlu0 %v57_v1  ;;  %vm44_vm2 = vcmask 7168  }
   0x2   :  { %v14_v2 = vsel %vm13_vm0, %v11_v0, -inf  ;;  %v12_v3 = vld [vmem:[%s87_s1] sm:$0xff]  ;;  %v26_v10 = vand.u32 127, %v25_v9 }
   0x3   :  { %15 = vmax.xlane.f32.xlu0 %v14_v2 }
  0x17   :  { %28 = vperm.xlu0 %52, %v12_v3  }
  0x76   :  { %v16_v4 = vpop.xlane.xlu0 %15 }
  0x77   :  { %v17_v5 = vsub.f32 %v11_v0, %v16_v4 }
  0x79   :  { %v18_v6 = vmul.f32 1.442695, %v17_v5 }
  0x7b   :  { %53 = vpow2.f32 %v18_v6 }
  0x81   :  { %v54_v7 = vpop.eup %53 }
  0x82   :  { %v20_v8 = vsel %vm13_vm0, %v54_v7, 0.0 }
  0x83   :  { %21 = vadd.xlane.f32.xlu1 %v20_v8 }
  0x89   :  { %v29_v11 = vpop.permute.xlu0 %28 }
  0x8a   :  { %vm30_vm1 = vcmp.eq.s32.totalorder %v26_v10, %v29_v11 }
  0x8b   :  { %v31_v13 = vsel %vm30_vm1, 0.903125, %v58_v12 }
  0x8c   :  { %v32_v14 = vmul.f32 %v31_v13, %v17_v5 }
  0x8e   :  { %v33_v15 = vsel %vm13_vm0, %v32_v14, 0.0 }
  0x8f   :  { %34 = vadd.xlane.f32.xlu1 %v33_v15 }
  0xf6   :  { %v22_v16 = vpop.xlane.xlu1 %21 }
  0xf7   :  { %55 = vlog2.f32 %v22_v16 }
  0xfd   :  { %v56_v17 = vpop.eup %55 }
  0xfe   :  { %v24_v18 = vmul.f32 0.6931472, %v56_v17 }
 0x102   :  { %v35_v19 = vpop.xlane.xlu1 %34 }
 0x103   :  { %v36_v20 = vsub.f32 %v24_v18, %v35_v19 }
 0x105   :  { %45 = vst.msk [vmem:[%s88_s2] sm:$0xff] %vm44_vm2, %v36_v20 }

</bundles_post_ra>
